<compile_context>
chip_gen: v5e
topology: v5e:2x2
jax: 0.10.0
libtpu: 0.0.40
codegen_flags: <defaults>
</compile_context>

<pallas_src>
import jax
import jax.numpy as jnp
from jax.experimental import pallas as pl
from jax.experimental.pallas import tpu as pltpu

_LANE = 128
_SUBLANE = 8


def _round_up(x, m):
    return (x + m - 1) // m * m


def _drift_mlp_kernel(x_ref, t_ref, w1x_ref, w1t_ref, b1_ref, w2_ref, b2_ref,
                      o_ref):
    # Layer 1: MXU matmul of x against the x-rows of W1 (bf16 operands cast
    # in-kernel, f32 accumulation) + rank-1 t-term + bias on the VPU in f32.
    h = jnp.dot(x_ref[...].astype(jnp.bfloat16), w1x_ref[...],
                preferred_element_type=jnp.float32)
    h = h + t_ref[...] * w1t_ref[...] + b1_ref[...]
    h = jnp.maximum(h, 0.0)
    # Layer 2: only the MXU operands are bf16; output is written D-wide.
    y = jnp.dot(h.astype(jnp.bfloat16), w2_ref[...],
                preferred_element_type=jnp.float32)
    o_ref[...] = (y + b2_ref[...]).astype(o_ref.dtype)


def _tpu_info():
    try:
        return pltpu.get_tpu_info()
    except Exception:  # hardware query only; never guards the kernel itself
        return None


def _default_vmem_limit():
    info = _tpu_info()
    cap = getattr(info, "vmem_capacity_bytes", None) if info is not None else None
    if not cap:
        cap = 64 << 20                     # conservative (v7x-sized VMEM)
    # ~64 MiB on v5e/v6e (128 MiB physical), ~48 MiB on v7x (64 MiB physical).
    return int(min(64 << 20, cap * 3 // 4))


def _num_tensorcores():
    info = _tpu_info()
    if info is None:
        return 1
    for attr in ("num_tensorcores", "num_tensor_cores", "tensorcores_per_chip",
                 "num_cores", "cores_per_chip"):
        v = getattr(info, attr, None)
        if isinstance(v, int) and v >= 1:
            return v
    return 1


def _choose_tile_b(B, D, h_pad, vmem_limit_bytes, num_cores):
    d_vmem = _round_up(D, _LANE)
    # Per-row VMEM bytes (lane-padded), double-buffered in/out tiles + temporaries.
    per_row = (2 * 4 * d_vmem      # x tile (f32), 2 pipeline buffers
               + 2 * 4 * _LANE     # t tile (tile_b, 1) lane-padded, 2 buffers
               + 2 * 4 * d_vmem    # out tile (<= f32), 2 buffers
               + 6 * h_pad         # h in f32 + bf16 copy
               + 4 * d_vmem)       # y accumulator before store
    # Resident weights/biases (constant index_map), worst-case double-buffered.
    weights = 2 * (2 * (D * h_pad + h_pad * d_vmem)
                   + 4 * (2 * h_pad + _LANE + d_vmem))
    budget = int(0.75 * vmem_limit_bytes) - weights - (512 << 10)
    tile = budget // per_row if per_row > 0 else _SUBLANE
    tile = max(_SUBLANE, min(4096, (tile // _SUBLANE) * _SUBLANE))
    b8 = _round_up(B, _SUBLANE)
    if num_cores <= 1:
        # Single TensorCore (v5e/v6e): one biggest tile, no forced split
        # (a mem-bound kernel gains nothing from pipelining DMA against DMA).
        return min(tile, b8)
    # Multi-TC (v7x): give every core at least one grid step when B allows.
    per_core = _round_up(-(-b8 // num_cores), _SUBLANE)
    return max(_SUBLANE, min(tile, per_core))


def abstract_drift_forward(x, t, w1, b1, w2, b2, *, tile_b=None, out_dtype=None,
                           vmem_limit_bytes=None):
    """Fused cat((x, t), -1) -> Linear -> ReLU -> Linear (AbstractDrift.forward).

    x: (B, D), t: (B,) or (B, 1), w1: (D+1, H), b1: (H,), w2: (H, D), b2: (D,).
    """
    B, D = x.shape
    H = w1.shape[1]
    assert w1.shape[0] == D + 1 and w2.shape == (H, D)
    assert b1.shape == (H,) and b2.shape == (D,)
    out_dtype = x.dtype if out_dtype is None else out_dtype
    if vmem_limit_bytes is None:
        vmem_limit_bytes = _default_vmem_limit()
    num_cores = _num_tensorcores()

    # Hidden dim padded to lane width so W1's output / W2's contraction stay
    # lane-dense (pad to 256 on v6e/v7x if H/D ever grow past HBM-bound sizes).
    h_pad = _round_up(H, _LANE)

    if tile_b is None:
        tile_b = _choose_tile_b(B, D, h_pad, vmem_limit_bytes, num_cores)
    tile_b = max(_SUBLANE, _round_up(int(tile_b), _SUBLANE))
    b_pad = _round_up(max(B, tile_b), tile_b)
    grid = (b_pad // tile_b,)

    # x and t go straight into the kernel (no host-side padded concat slab);
    # the concat is exact as a rank-1 term:  h = x @ W1[:D] + t * W1[D] + b1.
    t2 = jnp.asarray(t).reshape(B, 1).astype(jnp.float32)
    x_in, t_in = x, t2
    if b_pad != B:  # ragged batch: pads only when B is not a tile multiple
        x_in = jnp.zeros((b_pad, D), x.dtype).at[:B].set(x)
        t_in = jnp.zeros((b_pad, 1), jnp.float32).at[:B].set(t2)

    # Tiny weight/bias prep (negligible): bf16 MXU weights with zero-padded
    # hidden columns/rows (numerically exact), f32 biases and t-row.
    w1x = jnp.zeros((D, h_pad), jnp.bfloat16).at[:, :H].set(
        w1[:D].astype(jnp.bfloat16))
    w1t = jnp.zeros((1, h_pad), jnp.float32).at[0, :H].set(
        w1[D].astype(jnp.float32))
    b1p = jnp.zeros((1, h_pad), jnp.float32).at[0, :H].set(b1.astype(jnp.float32))
    w2p = jnp.zeros((h_pad, D), jnp.bfloat16).at[:H, :].set(w2.astype(jnp.bfloat16))
    b2p = b2.reshape(1, D).astype(jnp.float32)

    def const(shape):  # resident operand (constant index_map)
        return pl.BlockSpec(shape, lambda i: (0, 0))

    in_specs = [
        pl.BlockSpec((tile_b, D), lambda i: (i, 0)),   # x tile (full-D block)
        pl.BlockSpec((tile_b, 1), lambda i: (i, 0)),   # t column
        const((D, h_pad)),                             # W1[:D]  (resident)
        const((1, h_pad)),                             # W1[D]   (t row)
        const((1, h_pad)),                             # b1
        const((h_pad, D)),                             # W2
        const((1, D)),                                 # b2
    ]
    out_specs = pl.BlockSpec((tile_b, D), lambda i: (i, 0))   # D-wide output

    # Feed both TensorCores on v7x; plain PARALLEL on single-TC v5e/v6e.
    if num_cores >= 2 and grid[0] % num_cores == 0:
        batch_sem = pltpu.CORE_PARALLEL
    else:
        batch_sem = pltpu.PARALLEL

    out = pl.pallas_call(
        _drift_mlp_kernel,
        out_shape=jax.ShapeDtypeStruct((b_pad, D), out_dtype),
        grid_spec=pltpu.PrefetchScalarGridSpec(
            num_scalar_prefetch=0,
            grid=grid,
            in_specs=in_specs,
            out_specs=out_specs,
        ),
        compiler_params=pltpu.CompilerParams(
            dimension_semantics=(batch_sem,),
            vmem_limit_bytes=int(vmem_limit_bytes),
        ),
    )(x_in, t_in, w1x, w1t, b1p, w2p, b2p)

    return out if b_pad == B else out[:B]


def _reference(x, t, w1, b1, w2, b2):
    xt = jnp.concatenate([x, t], axis=-1)
    h = jnp.maximum(xt @ w1 + b1, 0.0)
    return h @ w2 + b2


if __name__ == "__main__":
    key = jax.random.PRNGKey(0)
    B, D, H = 8, 32, 64                      # small shapes

    k_x, k_t, k_w1, k_b1, k_w2, k_b2 = jax.random.split(key, 6)
    x = jax.random.normal(k_x, (B, D), dtype=jnp.float32)
    t = jax.random.uniform(k_t, (B, 1), dtype=jnp.float32)

    # Deterministic synthetic parameters (self.nn is abstract in AbstractDrift).
    w1 = jax.random.normal(k_w1, (D + 1, H), dtype=jnp.float32) * 0.1
    b1 = jax.random.normal(k_b1, (H,), dtype=jnp.float32) * 0.1
    w2 = jax.random.normal(k_w2, (H, D), dtype=jnp.float32) * 0.1
    b2 = jax.random.normal(k_b2, (D,), dtype=jnp.float32) * 0.1

    y = abstract_drift_forward(x, t, w1, b1, w2, b2)
    y = jax.block_until_ready(y)

    y_ref = _reference(x, t, w1, b1, w2, b2)
    assert y.shape == (B, D)
    # bf16 MXU operands -> looser tolerance vs the f32 reference.
    assert jnp.allclose(y, y_ref, atol=3e-2, rtol=3e-2), "mismatch vs reference"

    print("KERNEL_OK")
</pallas_src>

<mosaic_0001>
module attributes {stable_mosaic.version = 11 : i64} {
  func.func @_drift_mlp_kernel(%arg0: i32, %arg1: memref<8x32xf32, #tpu.memory_space<vmem>>, %arg2: memref<8x1xf32, #tpu.memory_space<vmem>>, %arg3: memref<32x128xbf16, #tpu.memory_space<vmem>>, %arg4: memref<1x128xf32, #tpu.memory_space<vmem>>, %arg5: memref<1x128xf32, #tpu.memory_space<vmem>>, %arg6: memref<128x32xbf16, #tpu.memory_space<vmem>>, %arg7: memref<1x32xf32, #tpu.memory_space<vmem>>, %arg8: memref<8x32xf32, #tpu.memory_space<vmem>>) attributes {dimension_semantics = [#tpu.dimension_semantics<parallel>], iteration_bounds = array<i64: 1>, scalar_prefetch = 0 : i64, scratch_operands = 0 : i64, tpu.core_type = #tpu.core_type<tc>, window_params = [{transform_indices = @transform_0, window_bounds = array<i64: 8, 32>}, {transform_indices = @transform_1, window_bounds = array<i64: 8, 1>}, {pipeline_mode = #tpu.pipeline_mode<synchronous>, transform_indices = @transform_2, window_bounds = array<i64: 32, 128>}, {pipeline_mode = #tpu.pipeline_mode<synchronous>, transform_indices = @transform_3, window_bounds = array<i64: 1, 128>}, {pipeline_mode = #tpu.pipeline_mode<synchronous>, transform_indices = @transform_4, window_bounds = array<i64: 1, 128>}, {pipeline_mode = #tpu.pipeline_mode<synchronous>, transform_indices = @transform_5, window_bounds = array<i64: 128, 32>}, {pipeline_mode = #tpu.pipeline_mode<synchronous>, transform_indices = @transform_6, window_bounds = array<i64: 1, 32>}, {transform_indices = @transform_7, window_bounds = array<i64: 8, 32>}]} {
    %c0 = arith.constant 0 : index
    %c0_0 = arith.constant 0 : index
    %0 = vector.load %arg1[%c0, %c0_0] : memref<8x32xf32, #tpu.memory_space<vmem>>, vector<8x32xf32>
    %1 = arith.truncf %0 : vector<8x32xf32> to vector<8x32xbf16>
    %c0_1 = arith.constant 0 : index
    %c0_2 = arith.constant 0 : index
    %2 = vector.load %arg3[%c0_1, %c0_2] : memref<32x128xbf16, #tpu.memory_space<vmem>>, vector<32x128xbf16>
    %cst = arith.constant dense<0.000000e+00> : vector<8x128xf32>
    %3 = tpu.matmul %1, %2, %cst {dimension_numbers = #tpu.dot_dimension_numbers<[1], [0], [0], [1], [0, 0, 1, 1], [], []>} : vector<8x32xbf16>, vector<32x128xbf16>, vector<8x128xf32> -> vector<8x128xf32>
    %c0_3 = arith.constant 0 : index
    %c0_4 = arith.constant 0 : index
    %4 = vector.load %arg2[%c0_3, %c0_4] : memref<8x1xf32, #tpu.memory_space<vmem>>, vector<8x1xf32>
    %c0_5 = arith.constant 0 : index
    %c0_6 = arith.constant 0 : index
    %5 = vector.load %arg4[%c0_5, %c0_6] : memref<1x128xf32, #tpu.memory_space<vmem>>, vector<1x128xf32>
    %6 = vector.broadcast %4 : vector<8x1xf32> to vector<8x128xf32>
    %7 = vector.broadcast %5 : vector<1x128xf32> to vector<8x128xf32>
    %8 = arith.mulf %6, %7 : vector<8x128xf32>
    %9 = arith.addf %3, %8 : vector<8x128xf32>
    %c0_7 = arith.constant 0 : index
    %c0_8 = arith.constant 0 : index
    %10 = vector.load %arg5[%c0_7, %c0_8] : memref<1x128xf32, #tpu.memory_space<vmem>>, vector<1x128xf32>
    %11 = vector.broadcast %10 : vector<1x128xf32> to vector<8x128xf32>
    %12 = arith.addf %9, %11 : vector<8x128xf32>
    %cst_9 = arith.constant 0.000000e+00 : f32
    %13 = vector.broadcast %cst_9 : f32 to vector<8x128xf32>
    %14 = arith.maximumf %12, %13 : vector<8x128xf32>
    %15 = arith.truncf %14 : vector<8x128xf32> to vector<8x128xbf16>
    %c0_10 = arith.constant 0 : index
    %c0_11 = arith.constant 0 : index
    %16 = vector.load %arg6[%c0_10, %c0_11] : memref<128x32xbf16, #tpu.memory_space<vmem>>, vector<128x32xbf16>
    %cst_12 = arith.constant dense<0.000000e+00> : vector<8x32xf32>
    %17 = tpu.matmul %15, %16, %cst_12 {dimension_numbers = #tpu.dot_dimension_numbers<[1], [0], [0], [1], [0, 0, 1, 1], [], []>} : vector<8x128xbf16>, vector<128x32xbf16>, vector<8x32xf32> -> vector<8x32xf32>
    %c0_13 = arith.constant 0 : index
    %c0_14 = arith.constant 0 : index
    %18 = vector.load %arg7[%c0_13, %c0_14] : memref<1x32xf32, #tpu.memory_space<vmem>>, vector<1x32xf32>
    %19 = vector.broadcast %18 : vector<1x32xf32> to vector<8x32xf32>
    %20 = arith.addf %17, %19 : vector<8x32xf32>
    %c0_15 = arith.constant 0 : index
    %c0_16 = arith.constant 0 : index
    %21 = vector.load %arg8[%c0_15, %c0_16] : memref<8x32xf32, #tpu.memory_space<vmem>>, vector<8x32xf32>
    tpu.vector_store %arg8[%c0_15, %c0_16], %20 {strides = array<i32>} : memref<8x32xf32, #tpu.memory_space<vmem>>, vector<8x32xf32>,
    return
  }
  func.func @transform_0(%arg0: i32) -> (i32, i32) {
    %c0_i32 = arith.constant 0 : i32
    %c0_i32_0 = arith.constant 0 : i32
    return %arg0, %c0_i32 : i32, i32
  }
  func.func @transform_1(%arg0: i32) -> (i32, i32) {
    %c0_i32 = arith.constant 0 : i32
    %c0_i32_0 = arith.constant 0 : i32
    return %arg0, %c0_i32 : i32, i32
  }
  func.func @transform_2(%arg0: i32) -> (i32, i32) {
    %c0_i32 = arith.constant 0 : i32
    %c0_i32_0 = arith.constant 0 : i32
    %c0_i32_1 = arith.constant 0 : i32
    return %c0_i32, %c0_i32_0 : i32, i32
  }
  func.func @transform_3(%arg0: i32) -> (i32, i32) {
    %c0_i32 = arith.constant 0 : i32
    %c0_i32_0 = arith.constant 0 : i32
    %c0_i32_1 = arith.constant 0 : i32
    return %c0_i32, %c0_i32_0 : i32, i32
  }
  func.func @transform_4(%arg0: i32) -> (i32, i32) {
    %c0_i32 = arith.constant 0 : i32
    %c0_i32_0 = arith.constant 0 : i32
    %c0_i32_1 = arith.constant 0 : i32
    return %c0_i32, %c0_i32_0 : i32, i32
  }
  func.func @transform_5(%arg0: i32) -> (i32, i32) {
    %c0_i32 = arith.constant 0 : i32
    %c0_i32_0 = arith.constant 0 : i32
    %c0_i32_1 = arith.constant 0 : i32
    return %c0_i32, %c0_i32_0 : i32, i32
  }
  func.func @transform_6(%arg0: i32) -> (i32, i32) {
    %c0_i32 = arith.constant 0 : i32
    %c0_i32_0 = arith.constant 0 : i32
    %c0_i32_1 = arith.constant 0 : i32
    return %c0_i32, %c0_i32_0 : i32, i32
  }
  func.func @transform_7(%arg0: i32) -> (i32, i32) {
    %c0_i32 = arith.constant 0 : i32
    %c0_i32_0 = arith.constant 0 : i32
    return %arg0, %c0_i32 : i32, i32
  }
}

</mosaic_0001>

<bundles_post_ra>
// kernel: tpu_custom_call.1
= control target key start
LH: loop header
LB: loop body
LE: loop exit
PB: predicated region body
PF: predicated region fallthrough
CT: control target
= control target key end

     0   :  { %v262_v1 = vmov 0   ;;  %s354_s0 = inlined_call_operand.vmem [shape: f32[8,32], index: 0, kind: input, shape index: {}]   ;;  %s355_s1 = inlined_call_operand.vmem [shape: f32[8,1], index: 1, kind: input, shape index: {}]   ;;  %s356_s2 = inlined_call_operand.vmem [shape: bf16[32,128], index: 2, kind: input, shape index: {}]   ;;  %s357_s3 = inlined_call_operand.vmem [shape: f32[1,128], index: 3, kind: input, shape index: {}]   ;;  %s358_s4 = inlined_call_operand.vmem [shape: f32[1,128], index: 4, kind: input, shape index: {}]   ;;  %s359_s5 = inlined_call_operand.vmem [shape: bf16[128,32], index: 5, kind: input, shape index: {}]   ;;  %s360_s6 = inlined_call_operand.vmem [shape: f32[1,32], index: 6, kind: input, shape index: {}]   ;;  %s361_s7 = inlined_call_operand.hbm [shape: f32[8,32], index: 7, kind: output, shape index: {}]  }
   0x1   :  { %v221_v0 = vld [vmem:[%s356_s2 + $0x8] sm:$0xff]  ;;  %232 = vset.pattern.permute.xlu0 %v262_v1  ;;  %v34_v2 = vld [vmem:[%s355_s1] sm:$0xff]  ;;  %v229_v3 = vld [vmem:[%s359_s5 + $0x38] sm:$0xff] }
   0x2   :  { %67 = vmatpush.bf16.msra.mxu0 %v221_v0  ;;  %v220_v4 = vld [vmem:[%s356_s2] sm:$0xff]  ;;  %38 = vperm.xlu0 %232, %v34_v2   ;;  %v228_v6 = vld [vmem:[%s359_s5 + $0x30] sm:$0xff] }
   0x3   :  { %v28_v5 = vld [vmem:[%s354_s0] sm:$0xff]  ;;  %149 = vmatpush.bf16.msra.mxu1 %v229_v3 }
   0x4   :  { %12 = vsyncpa [#allocation3], 0  ;;  %v29_v7 = vpack.c.bf16 %v28_v5, %v28_v5  ;;  %vm57_vm0 = vcmask 261120   ;;  %v227_v8 = vld [vmem:[%s359_s5 + $0x28] sm:$0xff]  ;;  %v226_v9 = vld [vmem:[%s359_s5 + $0x20] sm:$0xff]  ;;  %s263_s27 = smov [#allocation2]  }
   0x5   :  { %v225_v10 = vld [vmem:[%s359_s5 + $0x18] sm:$0xff]  ;;  %v224_v11 = vld [vmem:[%s359_s5 + $0x10] sm:$0xff]  ;;  %v223_v12 = vld [vmem:[%s359_s5 + $0x8] sm:$0xff]  ;;  %s168_s28 = sshll.u32 %s263_s27, 4  ;;  %s170_s30 = sshll.u32 %s361_s7, 4  ;;  %s169_s28 = int_to_ptr.vmem [resolvable:$true] %s168_s28  ;;  %s171_s30 = int_to_ptr.hbm [resolvable:$true] %s170_s30 }
   0x6   :  { %68 = vmatpush.bf16.msra.mxu0 %v220_v4  ;;  %v222_v13 = vld [vmem:[%s359_s5] sm:$0xff] }
   0x7   :  { %150 = vmatpush.bf16.msra.mxu1 %v228_v6  ;;  %v233_v14 = vld [vmem:[%s357_s3] ss:$0 sm:$0xff] }
   0x8   :  { %v234_v17 = vld [vmem:[%s358_s4] ss:$0 sm:$0xff] }
   0x9   :  { %187 = vmatmul.msk.bf16.vlgmr.msra.gmra.mxu0 %vm57_vm0, %v29_v7  ;;  %v235_v24 = vld [vmem:[%s360_s6] ss:$0 sm:$0xff] }
   0xb   :  { %151 = vmatpush.bf16.msra.mxu1 %v227_v8 }
   0xf   :  { %152 = vmatpush.bf16.msra.mxu1 %v226_v9 }
  0x13   :  { %153 = vmatpush.bf16.msra.mxu1 %v225_v10 }
  0x17   :  { %154 = vmatpush.bf16.msra.mxu1 %v224_v11 }
  0x1b   :  { %155 = vmatpush.bf16.msra.mxu1 %v223_v12 }
  0x1f   :  { %156 = vmatpush.bf16.msra.mxu1 %v222_v13 }
  0x74   :  { %v39_v15 = vpop.permute.xlu0 %38 }
  0x75   :  { %v44_v16 = vmul.f32 %v233_v14, %v39_v15 }
  0x86   :  { %v70_v18 = vpop.f32.mrf.mxu0 }
  0x87   :  { %v71_v19 = vadd.f32 %v70_v18, %v44_v16 }
  0x89   :  { %v78_v20 = vadd.f32 %v234_v17, %v71_v19 }
  0x8b   :  { %v79_v21 = vmax.f32 %v78_v20, 0.0 }
  0x8d   :  { %v80_v22 = vpack.c.bf16 %v79_v21, %v79_v21 }
  0x8e   :  { %v72_v23 = vpop.f32.mrf.mxu0 }
  0x8f   :  { %157 = vmatmul.bf16.vlgmr.msra.gmra.mxu1 %v80_v22 }
 0x10c   :  { %v158_v25 = vpop.f32.mrf.mxu1 }
 0x10d   :  { %v159_v26 = vadd.f32 %v235_v24, %v158_v25 }
 0x10f   :  { %162 = vst.msk [vmem:[#allocation2] sm:$0xff] %vm57_vm0, %v159_v26 }
 0x110   :  { %173 = dma.vmem_to_hbm [thread:$0]  %s169_s28, 128, %s171_s30, [#allocation3]  }
 0x114   :  { %v160_v27 = vpop.f32.mrf.mxu1 }
 0x115   :  { %260 = dma.done.wait [#allocation3], 128  }
 0x116   :  { %261 = vsyncadd [#allocation3], 4294967168 }
 0x117   :  { %178 = vsyncpa [#allocation3], 1 }

</bundles_post_ra>
